<compile_context>
chip_gen: v5e
topology: v5e:2x2
jax: 0.10.0
libtpu: 0.0.40
codegen_flags: <defaults>
</compile_context>

<pallas_src>
import jax
import jax.numpy as jnp
from jax.experimental import pallas as pl
from jax.experimental.pallas import tpu as pltpu

CLAMP_MIN = 1.0
CLAMP_MAX = 1.5
BN_EPS = 0.0003


def conv_bn_clamp_kernel(w_ref, p_ref, par_ref, o_ref):
    """w_ref: (C_out, K) f32; p_ref: (M, K) f32 with M = N*Ho*Wo ordered
    (n, oh, ow); par_ref: (C_out, 2) [gamma|beta]; o_ref: (N, C_out, Ho*Wo)."""
    # MXU: (C_out, K) . (M, K)^T -> (C_out, M), f32 accumulation.
    conv = jax.lax.dot_general(
        w_ref[...], p_ref[...],
        dimension_numbers=(((1,), (1,)), ((), ())),
        preferred_element_type=jnp.float32)

    # BatchNorm2d, training mode: per-channel batch mean / biased variance
    # over the M = N*Ho*Wo positions (lane-axis reductions on one vreg).
    # The conv bias is intentionally omitted: it is cancelled exactly by the
    # mean subtraction below.
    mean = jnp.mean(conv, axis=-1, keepdims=True)                 # (C_out, 1)
    centered = conv - mean
    var = jnp.mean(centered * centered, axis=-1, keepdims=True)   # (C_out, 1)

    gamma = par_ref[:, 0:1]                                       # (C_out, 1)
    beta = par_ref[:, 1:2]                                        # (C_out, 1)
    scale = gamma * jax.lax.rsqrt(var + BN_EPS)                   # folded scale
    bn = centered * scale + beta

    # clamp(min=1.0) then clamp(max=1.5)
    bn = jnp.minimum(jnp.maximum(bn, CLAMP_MIN), CLAMP_MAX)

    # Store per-batch (C_out, Ho*Wo) slabs: static lane slices, no relayout.
    n_batch, _, hw = o_ref.shape
    for n in range(n_batch):
        o_ref[n] = bn[:, n * hw:(n + 1) * hw]


@jax.jit
def model_forward(x, weight, bias, gamma, beta):
    """x: (N, C_in, H, W) float32 NCHW (PyTorch convention).

    `bias` is accepted for interface fidelity but unused: train-mode BN
    subtracts the batch mean, which cancels a per-channel conv bias exactly.
    """
    del bias  # mathematically cancelled by BN mean subtraction
    N, C_in, H, W = x.shape
    C_out, _, kH, kW = weight.shape
    stride, pad = 2, 1
    H_out = (H + 2 * pad - kH) // stride + 1
    W_out = (W + 2 * pad - kW) // stride + 1
    K = C_in * kH * kW
    M = N * H_out * W_out

    # Single fused XLA im2col emitting NHWC patches: feature dim ordered
    # (c_in, kh, kw) with c_in slowest, matching weight.reshape(C_out, K).
    patches = jax.lax.conv_general_dilated_patches(
        x,
        filter_shape=(kH, kW),
        window_strides=(stride, stride),
        padding=((pad, pad), (pad, pad)),
        dimension_numbers=('NCHW', 'OIHW', 'NHWC'),
    )                                                  # (N, Ho, Wo, K)
    p_mk = patches.reshape(M, K)                       # contiguous, copy-free

    w2d = weight.reshape(C_out, K)                     # (C_out, K) f32
    params = jnp.stack([gamma, beta], axis=1).astype(jnp.float32)  # (C_out, 2)

    vmem = pltpu.MemorySpace.VMEM
    bytes_accessed = 4 * (C_out * K + M * K + C_out * 2 + N * C_out * H_out * W_out)
    cost = pl.CostEstimate(flops=2 * C_out * K * M,
                           transcendentals=0,
                           bytes_accessed=bytes_accessed)

    out3 = pl.pallas_call(
        conv_bn_clamp_kernel,
        out_shape=jax.ShapeDtypeStruct((N, C_out, H_out * W_out), jnp.float32),
        in_specs=[
            pl.BlockSpec((C_out, K), lambda: (0, 0), memory_space=vmem),
            pl.BlockSpec((M, K), lambda: (0, 0), memory_space=vmem),
            pl.BlockSpec((C_out, 2), lambda: (0, 0), memory_space=vmem),
        ],
        out_specs=pl.BlockSpec((N, C_out, H_out * W_out), lambda: (0, 0, 0),
                               memory_space=vmem),
        cost_estimate=cost,
    )(w2d, p_mk, params)

    # Trailing-dim split only (row-major contiguous) -> NCHW.
    return out3.reshape(N, C_out, H_out, W_out)


def reference_forward(x, weight, bias, gamma, beta):
    """Pure-JAX fp32 reference of the PyTorch module (training-mode BN)."""
    conv = jax.lax.conv_general_dilated(
        x, weight, window_strides=(2, 2), padding=((1, 1), (1, 1)),
        dimension_numbers=('NCHW', 'OIHW', 'NCHW'),
        precision=jax.lax.Precision.HIGHEST)
    conv = conv + bias[None, :, None, None]
    mean = conv.mean(axis=(0, 2, 3), keepdims=True)
    var = ((conv - mean) ** 2).mean(axis=(0, 2, 3), keepdims=True)
    bn = ((conv - mean) * jax.lax.rsqrt(var + BN_EPS)
          * gamma[None, :, None, None] + beta[None, :, None, None])
    return jnp.clip(bn, CLAMP_MIN, CLAMP_MAX)


if __name__ == "__main__":
    key = jax.random.PRNGKey(0)
    k_x, k_w, k_b = jax.random.split(key, 3)

    N, C_in, H, W = 2, 16, 16, 16
    C_out, kH, kW = 8, 3, 3

    x = jax.random.normal(k_x, (N, C_in, H, W), dtype=jnp.float32)

    # Deterministic parameter init (Conv2d-like uniform fan-in, BN defaults).
    fan_in = C_in * kH * kW
    bound = 1.0 / (fan_in ** 0.5)
    weight = jax.random.uniform(k_w, (C_out, C_in, kH, kW),
                                minval=-bound, maxval=bound, dtype=jnp.float32)
    bias = jax.random.uniform(k_b, (C_out,),
                              minval=-bound, maxval=bound, dtype=jnp.float32)
    gamma = jnp.ones((C_out,), dtype=jnp.float32)
    beta = jnp.zeros((C_out,), dtype=jnp.float32)

    out = model_forward(x, weight, bias, gamma, beta)
    jax.block_until_ready(out)
    assert out.shape == (N, C_out, H // 2, W // 2)

    ref = reference_forward(x, weight, bias, gamma, beta)
    max_err = float(jnp.max(jnp.abs(out - ref)))
    assert max_err < 1e-3, f"mismatch vs fp32 reference: {max_err}"
    print("KERNEL_OK")
</pallas_src>

<mosaic_0001>
module attributes {stable_mosaic.version = 11 : i64} {
  func.func @conv_bn_clamp_kernel(%arg0: memref<8x144xf32, #tpu.memory_space<vmem>>, %arg1: memref<128x144xf32, #tpu.memory_space<vmem>>, %arg2: memref<8x2xf32, #tpu.memory_space<vmem>>, %arg3: memref<2x8x64xf32, #tpu.memory_space<vmem>>) attributes {dimension_semantics = [], scalar_prefetch = 0 : i64, scratch_operands = 0 : i64, tpu.core_type = #tpu.core_type<tc>} {
    %c0 = arith.constant 0 : index
    %c0_0 = arith.constant 0 : index
    %0 = vector.load %arg0[%c0, %c0_0] : memref<8x144xf32, #tpu.memory_space<vmem>>, vector<8x144xf32>
    %c0_1 = arith.constant 0 : index
    %c0_2 = arith.constant 0 : index
    %1 = vector.load %arg1[%c0_1, %c0_2] : memref<128x144xf32, #tpu.memory_space<vmem>>, vector<128x144xf32>
    %cst = arith.constant dense<0.000000e+00> : vector<8x128xf32>
    %2 = tpu.matmul %0, %1, %cst {dimension_numbers = #tpu.dot_dimension_numbers<[1], [1], [0], [0], [0, 0, 1, 0], [], []>} : vector<8x144xf32>, vector<128x144xf32>, vector<8x128xf32> -> vector<8x128xf32>
    %cst_3 = arith.constant dense<0.000000e+00> : vector<8xf32>
    %3 = vector.multi_reduction <add>, %2, %cst_3 [1] : vector<8x128xf32> to vector<8xf32>
    %4 = vector.shape_cast %3 : vector<8xf32> to vector<8x1xf32>
    %cst_4 = arith.constant 1.280000e+02 : f32
    %5 = vector.broadcast %cst_4 : f32 to vector<8x1xf32>
    %6 = arith.divf %4, %5 : vector<8x1xf32>
    %7 = vector.broadcast %6 : vector<8x1xf32> to vector<8x128xf32>
    %8 = arith.subf %2, %7 : vector<8x128xf32>
    %9 = arith.mulf %8, %8 : vector<8x128xf32>
    %cst_5 = arith.constant dense<0.000000e+00> : vector<8xf32>
    %10 = vector.multi_reduction <add>, %9, %cst_5 [1] : vector<8x128xf32> to vector<8xf32>
    %11 = vector.shape_cast %10 : vector<8xf32> to vector<8x1xf32>
    %cst_6 = arith.constant 1.280000e+02 : f32
    %12 = vector.broadcast %cst_6 : f32 to vector<8x1xf32>
    %13 = arith.divf %11, %12 : vector<8x1xf32>
    %c0_7 = arith.constant 0 : index
    %c0_8 = arith.constant 0 : index
    %14 = vector.load %arg2[%c0_7, %c0_8] : memref<8x2xf32, #tpu.memory_space<vmem>>, vector<8x1xf32>
    %c0_9 = arith.constant 0 : index
    %c1 = arith.constant 1 : index
    %15 = vector.load %arg2[%c0_9, %c1] : memref<8x2xf32, #tpu.memory_space<vmem>>, vector<8x1xf32>
    %cst_10 = arith.constant 3.000000e-04 : f32
    %16 = vector.broadcast %cst_10 : f32 to vector<8x1xf32>
    %17 = arith.addf %13, %16 : vector<8x1xf32>
    %18 = math.rsqrt %17 : vector<8x1xf32>
    %19 = arith.mulf %14, %18 : vector<8x1xf32>
    %20 = vector.broadcast %19 : vector<8x1xf32> to vector<8x128xf32>
    %21 = arith.mulf %8, %20 : vector<8x128xf32>
    %22 = vector.broadcast %15 : vector<8x1xf32> to vector<8x128xf32>
    %23 = arith.addf %21, %22 : vector<8x128xf32>
    %cst_11 = arith.constant 1.000000e+00 : f32
    %24 = vector.broadcast %cst_11 : f32 to vector<8x128xf32>
    %25 = arith.maximumf %23, %24 : vector<8x128xf32>
    %cst_12 = arith.constant 1.500000e+00 : f32
    %26 = vector.broadcast %cst_12 : f32 to vector<8x128xf32>
    %27 = arith.minimumf %25, %26 : vector<8x128xf32>
    %28 = vector.extract_strided_slice %27 {offsets = [0, 0], sizes = [8, 64], strides = [1, 1]} : vector<8x128xf32> to vector<8x64xf32>
    %c0_13 = arith.constant 0 : index
    %c0_14 = arith.constant 0 : index
    %c0_15 = arith.constant 0 : index
    %29 = vector.load %arg3[%c0_13, %c0_14, %c0_15] : memref<2x8x64xf32, #tpu.memory_space<vmem>>, vector<1x8x64xf32>
    %30 = vector.shape_cast %29 : vector<1x8x64xf32> to vector<8x64xf32>
    %31 = vector.shape_cast %28 : vector<8x64xf32> to vector<1x8x64xf32>
    tpu.vector_store %arg3[%c0_13, %c0_14, %c0_15], %31 {strides = array<i32>} : memref<2x8x64xf32, #tpu.memory_space<vmem>>, vector<1x8x64xf32>,
    %32 = vector.extract_strided_slice %27 {offsets = [0, 64], sizes = [8, 64], strides = [1, 1]} : vector<8x128xf32> to vector<8x64xf32>
    %c1_16 = arith.constant 1 : index
    %c0_17 = arith.constant 0 : index
    %c0_18 = arith.constant 0 : index
    %33 = vector.load %arg3[%c1_16, %c0_17, %c0_18] : memref<2x8x64xf32, #tpu.memory_space<vmem>>, vector<1x8x64xf32>
    %34 = vector.shape_cast %33 : vector<1x8x64xf32> to vector<8x64xf32>
    %35 = vector.shape_cast %32 : vector<8x64xf32> to vector<1x8x64xf32>
    tpu.vector_store %arg3[%c1_16, %c0_17, %c0_18], %35 {strides = array<i32>} : memref<2x8x64xf32, #tpu.memory_space<vmem>>, vector<1x8x64xf32>,
    return
  }
}

</mosaic_0001>

<bundles_post_ra>
// kernel: model_forward.1
= control target key start
LH: loop header
LB: loop body
LE: loop exit
PB: predicated region body
PF: predicated region fallthrough
CT: control target
= control target key end

     0   :  { %vm48_vm0 = vcmask 130048   ;;  %v223_v37 = vmov 128.0   ;;  %v224_v48 = vmov 0   ;;  %v225_v49 = vmov 1   ;;  %s226_s26 = smov 64   ;;  %s375_s1 = inlined_call_operand.vmem [shape: f32[128,144], index: 1, kind: input, shape index: {}]   ;;  %s376_s0 = inlined_call_operand.vmem [shape: f32[8,144], index: 0, kind: input, shape index: {}]   ;;  %s377_s2 = inlined_call_operand.vmem [shape: f32[8,2], index: 2, kind: input, shape index: {}]   ;;  %s378_s3 = inlined_call_operand.vmem [shape: f32[2,8,64], index: 3, kind: output, shape index: {}]  }
   0x1   :  { %v46_v0 = vld [vmem:[%s375_s1 + $0xf0] sm:$0xff]  ;;  %v47_v1 = vld [vmem:[%s375_s1 + $0xf8] sm:$0xff]  ;;  %v44_v2 = vld [vmem:[%s375_s1 + $0xe0] sm:$0xff]  ;;  %219 = vrcp.f32 %v223_v37  ;;  %216 = vset.pattern.permute.xlu1 %v224_v48  ;;  %218 = vset.pattern.permute.xlu0 %v225_v49  ;;  %vm182_vm5 = vcmask 523264  }
   0x2   :  { %100 = vmatpush.xpose.msra.mxu0 %v46_v0  ;;  %194 = vmatpush.xpose.msk.msra.mxu1 %vm48_vm0, %v47_v1  ;;  %v45_v3 = vld [vmem:[%s375_s1 + $0xe8] sm:$0xff]  ;;  %v42_v4 = vld [vmem:[%s375_s1 + $0xd0] sm:$0xff]  ;;  %v43_v5 = vld [vmem:[%s375_s1 + $0xd8] sm:$0xff] }
   0x3   :  { %v40_v6 = vld [vmem:[%s375_s1 + $0xc0] sm:$0xff]  ;;  %v41_v7 = vld [vmem:[%s375_s1 + $0xc8] sm:$0xff]  ;;  %v38_v8 = vld [vmem:[%s375_s1 + $0xb0] sm:$0xff] }
   0x4   :  { %v39_v9 = vld [vmem:[%s375_s1 + $0xb8] sm:$0xff]  ;;  %v36_v10 = vld [vmem:[%s375_s1 + $0xa0] sm:$0xff]  ;;  %v37_v11 = vld [vmem:[%s375_s1 + $0xa8] sm:$0xff] }
   0x5   :  { %v34_v12 = vld [vmem:[%s375_s1 + $0x90] sm:$0xff]  ;;  %v35_v13 = vld [vmem:[%s375_s1 + $0x98] sm:$0xff]  ;;  %v32_v14 = vld [vmem:[%s375_s1 + $0x80] sm:$0xff] }
   0x6   :  { %101 = vmatpush.xpose.msra.mxu0 %v44_v2  ;;  %195 = vmatpush.xpose.msk.msra.mxu1 %vm48_vm0, %v45_v3  ;;  %v33_v15 = vld [vmem:[%s375_s1 + $0x88] sm:$0xff]  ;;  %v30_v16 = vld [vmem:[%s375_s1 + $0x70] sm:$0xff]  ;;  %v31_v17 = vld [vmem:[%s375_s1 + $0x78] sm:$0xff] }
   0x7   :  { %v28_v18 = vld [vmem:[%s375_s1 + $0x60] sm:$0xff]  ;;  %v29_v19 = vld [vmem:[%s375_s1 + $0x68] sm:$0xff]  ;;  %v26_v20 = vld [vmem:[%s375_s1 + $0x50] sm:$0xff]  ;;  %v220_v38 = vpop.eup %219 }
   0x8   :  { %v27_v21 = vld [vmem:[%s375_s1 + $0x58] sm:$0xff]  ;;  %v24_v22 = vld [vmem:[%s375_s1 + $0x40] sm:$0xff]  ;;  %v25_v23 = vld [vmem:[%s375_s1 + $0x48] sm:$0xff]  ;;  %v143_v39 = vmul.f32 128.0, %v220_v38  ;;  %vm147_vm1 = vweird.f32 %v220_v38 }
   0x9   :  { %v22_v24 = vld [vmem:[%s375_s1 + $0x30] sm:$0xff]  ;;  %v23_v25 = vld [vmem:[%s375_s1 + $0x38] sm:$0xff]  ;;  %v20_v26 = vld [vmem:[%s375_s1 + $0x20] sm:$0xff] }
   0xa   :  { %102 = vmatpush.xpose.msra.mxu0 %v42_v4  ;;  %196 = vmatpush.xpose.msk.msra.mxu1 %vm48_vm0, %v43_v5  ;;  %v21_v27 = vld [vmem:[%s375_s1 + $0x28] sm:$0xff]  ;;  %v18_v28 = vld [vmem:[%s375_s1 + $0x10] sm:$0xff]  ;;  %v19_v29 = vld [vmem:[%s375_s1 + $0x18] sm:$0xff]  ;;  %v144_v40 = vsub.f32 1.0, %v143_v39 }
   0xb   :  { %v16_v30 = vld [vmem:[%s375_s1] sm:$0xff]  ;;  %v17_v31 = vld [vmem:[%s375_s1 + $0x8] sm:$0xff] }
   0xc   :  { %v14_v32 = vld [vmem:[%s376_s0] sm:$0xff]  ;;  %v15_v33 = vld [vmem:[%s376_s0 + $0x8] sm:$0xff]  ;;  %v145_v41 = vmul.f32 %v220_v38, %v144_v40 }
   0xd   :  { %v155_v58 = vld [vmem:[%s377_s2] sm:$0xff] }
   0xe   :  { %103 = vmatpush.xpose.msra.mxu0 %v40_v6  ;;  %197 = vmatpush.xpose.msk.msra.mxu1 %vm48_vm0, %v41_v7  ;;  %v146_v42 = vadd.f32 %v220_v38, %v145_v41 }
  0x10   :  { %v148_v43 = vsel %vm147_vm1, %v220_v38, %v146_v42 }
  0x12   :  { %104 = vmatpush.xpose.msra.mxu0 %v38_v8  ;;  %198 = vmatpush.xpose.msk.msra.mxu1 %vm48_vm0, %v39_v9 }
  0x16   :  { %105 = vmatpush.xpose.msra.mxu0 %v36_v10  ;;  %199 = vmatpush.xpose.msk.msra.mxu1 %vm48_vm0, %v37_v11 }
  0x1a   :  { %106 = vmatpush.xpose.msra.mxu0 %v34_v12  ;;  %200 = vmatpush.xpose.msk.msra.mxu1 %vm48_vm0, %v35_v13 }
  0x1e   :  { %107 = vmatpush.xpose.msra.mxu0 %v32_v14  ;;  %201 = vmatpush.xpose.msk.msra.mxu1 %vm48_vm0, %v33_v15 }
  0x22   :  { %108 = vmatpush.xpose.msra.mxu0 %v30_v16  ;;  %202 = vmatpush.xpose.msk.msra.mxu1 %vm48_vm0, %v31_v17 }
  0x26   :  { %109 = vmatpush.xpose.msra.mxu0 %v28_v18  ;;  %203 = vmatpush.xpose.msk.msra.mxu1 %vm48_vm0, %v29_v19 }
  0x2a   :  { %110 = vmatpush.xpose.msra.mxu0 %v26_v20  ;;  %204 = vmatpush.xpose.msk.msra.mxu1 %vm48_vm0, %v27_v21 }
  0x2e   :  { %111 = vmatpush.xpose.msra.mxu0 %v24_v22  ;;  %205 = vmatpush.xpose.msk.msra.mxu1 %vm48_vm0, %v25_v23 }
  0x32   :  { %112 = vmatpush.xpose.msra.mxu0 %v22_v24  ;;  %206 = vmatpush.xpose.msk.msra.mxu1 %vm48_vm0, %v23_v25 }
  0x36   :  { %113 = vmatpush.xpose.msra.mxu0 %v20_v26  ;;  %207 = vmatpush.xpose.msk.msra.mxu1 %vm48_vm0, %v21_v27 }
  0x3a   :  { %114 = vmatpush.xpose.msra.mxu0 %v18_v28  ;;  %208 = vmatpush.xpose.msk.msra.mxu1 %vm48_vm0, %v19_v29 }
  0x3e   :  { %115 = vmatpush.xpose.msra.mxu0 %v16_v30  ;;  %209 = vmatpush.xpose.msk.msra.mxu1 %vm48_vm0, %v17_v31 }
  0x41   :  { %116 = vmatmul.f32.vlgmr.msra.gmra.mxu0 %v14_v32  ;;  %210 = vmatmul.msk.f32.vlgmr.msra.gmra.mxu1 %vm48_vm0, %v15_v33 }
  0xbe   :  { %v117_v34 = vpop.f32.mrf.mxu0  ;;  %v137_v35 = vpop.f32.mrf.mxu1 }
  0xbf   :  { %v138_v36 = vadd.f32 %v137_v35, %v117_v34 }
  0xc1   :  { %140 = vadd.xlane.f32.xlu0 %v138_v36 }
 0x134   :  { %v141_v44 = vpop.xlane.xlu0 %140 }
 0x135   :  { %v149_v45 = vmul.f32 %v148_v43, %v141_v44 }
 0x137   :  { %v150_v46 = vsub.f32 %v138_v36, %v149_v45 }
 0x139   :  { %v151_v47 = vmul.f32 %v150_v46, %v150_v46 }
 0x13b   :  { %152 = vadd.xlane.f32.xlu0 %v151_v47 }
 0x1ae   :  { %v153_v50 = vpop.xlane.xlu0 %152 }
 0x1af   :  { %v154_v51 = vmul.f32 %v153_v50, %v148_v43 }
 0x1b1   :  { %v156_v52 = vadd.f32 0.0003, %v154_v51 }
 0x1b3   :  { %221 = vrsqrt.f32 %v156_v52  ;;  %vm163_vm3 = vweird.f32 %v156_v52 }
 0x1b9   :  { %v222_v53 = vpop.eup %221 }
 0x1ba   :  { %v158_v54 = vmul.f32 %v222_v53, %v156_v52  ;;  %vm164_vm2 = vweird.f32 %v222_v53 }
 0x1bb   :  { %vm165_vm4 = vmor %vm163_vm3, %vm164_vm2 }
 0x1bc   :  { %v159_v55 = vmul.f32 %v222_v53, %v158_v54 }
 0x1be   :  { %v160_v56 = vmul.f32 0.5, %v159_v55 }
 0x1c0   :  { %v161_v57 = vsub.f32 1.5, %v160_v56 }
 0x1c2   :  { %v162_v59 = vmul.f32 %v222_v53, %v161_v57 }
 0x1c4   :  { %v166_v60 = vsel %vm165_vm4, %v222_v53, %v162_v59 }
 0x1c5   :  { %v167_v61 = vmul.f32 %v166_v60, %v155_v58 }
 0x1c7   :  { %170 = vperm.xlu1 %216, %v167_v61  }
 0x1cf   :  { %217 = vset.pattern.permute.xlu1 %v225_v49 }
 0x1d0   :  { %176 = vperm.xlu1 %217, %v155_v58  }
 0x239   :  { %v171_v62 = vpop.permute.xlu1 %170 }
 0x23a   :  { %v173_v63 = vmul.f32 %v171_v62, %v150_v46 }
 0x242   :  { %v177_v0 = vpop.permute.xlu1 %176 }
 0x243   :  { %v179_v1 = vadd.f32 %v177_v0, %v173_v63 }
 0x245   :  { %v180_v2 = vmax.f32 %v179_v1, 1.0 }
 0x247   :  { %v181_v3 = vmin.f32 %v180_v2, 1.5 }
 0x249   :  { %185 = vrot.lane.b32.xlu2 %v181_v3, %s226_s26  ;;  %183 = vst.msk [vmem:[%s378_s3] sm:$0xff] %vm182_vm5, %v181_v3 }
 0x2a3   :  { %v186_v4 = vpop.permute.xlu2 %185 }
 0x2a4   :  { %211 = vst.msk [vmem:[%s378_s3 + $0x8] sm:$0xff] %vm182_vm5, %v186_v4 }

</bundles_post_ra>
